<compile_context>
chip_gen: v5e
topology: v5e:2x2
jax: 0.10.0
libtpu: 0.0.40
codegen_flags: <defaults>
</compile_context>

<pallas_src>
import jax
import jax.numpy as jnp
from jax import lax
from jax.experimental import pallas as pl
from jax.experimental.pallas import tpu as pltpu


def _round_up(x, m):
    return ((x + m - 1) // m) * m


def _tpu_topology():
    """(TensorCores per chip, physical VMEM bytes) with conservative fallbacks."""
    vmem = 64 * 1024 * 1024                       # smallest across v5e/v6e/v7x
    try:
        vmem = int(getattr(pltpu.get_tpu_info(), "vmem_capacity_bytes", vmem))
    except Exception:
        pass
    kind = ""
    try:
        kind = jax.devices()[0].device_kind.lower()
    except Exception:
        pass
    num_tc = 2 if ("v7" in kind or "7x" in kind) else 1
    return num_tc, vmem


def _pick_tiling(B, Tp, E, H, num_tc, vmem_cap):
    """Pad the batch and pick the largest VMEM-fitting batch tile.

    Resident estimate per tile: double-buffered emb (bf16) and output (f32)
    blocks, single-buffered gi scratch (f32), hidden blocks, weights, headroom.
    """
    SUB = 16                                      # bf16 sublane tile (covers f32's 8)
    Bp = _round_up(max(B, SUB), SUB * num_tc)

    def resident(bb):
        return (2 * Tp * bb * E * 2               # emb block (bf16), double-buffered
                + 2 * Tp * bb * 2 * H * 4         # output block (f32), double-buffered
                + Tp * bb * 6 * H * 4             # gi scratch (f32), single
                + 4 * 2 * bb * H * 4              # h0 in + hid out (f32)
                + (E + 2 * H) * 6 * H * 2         # W_ih + W_hh (bf16)
                + 2 * 6 * H * 4                   # biases (f32)
                + (2 << 20))                      # compiler scratch headroom

    budget = int(vmem_cap * 0.70)
    bb = Bp // num_tc                             # multiple of SUB; divides Bp
    while bb > SUB and (Bp % bb != 0 or resident(bb) > budget):
        bb -= SUB
    vmem_limit = int(vmem_cap * 0.85)             # ~54 MiB on v7x, ~108 MiB on v5e/v6e
    return Bp, bb, vmem_limit


def _make_gru_kernel(Tp, Bb, E, H):
    G3 = 3 * H

    def kernel(lmax_ref, emb_ref, len_ref, h0_ref, wih_ref, bih_ref,
               whh_ref, bhh_ref, out_ref, hid_ref, gi_ref):
        # ---- Prologue: ONE hoisted bf16 GEMM (both dirs, all gates, all steps) --
        # Bb % 16 == 0, so merging (Tp, Bb) is a layout no-op for the bf16 block.
        x2d = emb_ref[...].reshape(Tp * Bb, E)
        gi = jnp.dot(x2d, wih_ref[...], preferred_element_type=jnp.float32)
        # Written straight into the scratch: no per-gate repack copy.
        gi_ref[...] = (gi + bih_ref[...]).reshape(Tp, Bb, 6 * H)

        lens = len_ref[...]                         # (Bb, 1) int32 sequence lengths
        whh = whh_ref[...]                          # (2H, 6H) bf16, block-diagonal
        bhh = bhh_ref[...]                          # (1, 6H) f32
        lmax = lmax_ref[pl.program_id(0)]           # SMEM scalar: tile's max length

        # pad_packed_sequence semantics: rows past the tile's max length are zero.
        zero_row = jnp.zeros((Bb, 2 * H), jnp.float32)

        def zero_tail(t, c):
            out_ref[t] = zero_row
            return c
        lax.fori_loop(lmax, Tp, zero_tail, 0)

        def gru_gates(gi3, gh3, h):
            # PyTorch GRU gate order r, z, n; all gate math kept in f32.
            r = jax.nn.sigmoid(gi3[:, 0:H] + gh3[:, 0:H])
            z = jax.nn.sigmoid(gi3[:, H:2 * H] + gh3[:, H:2 * H])
            n = jnp.tanh(gi3[:, 2 * H:G3] + r * gh3[:, 2 * H:G3])
            return (1.0 - z) * n + z * h

        def body(i, carry):
            h_f, h_b = carry
            tf = i
            tb = lmax - 1 - i
            # ONE fused MXU push per timestep serves both directions.
            h_cat = jnp.concatenate([h_f, h_b], axis=1).astype(jnp.bfloat16)
            gh = jnp.dot(h_cat, whh, preferred_element_type=jnp.float32) + bhh

            # ---- forward direction, step tf ----
            m_f = lens > tf                                      # (Bb, 1) validity
            h_f = jnp.where(m_f,
                            gru_gates(gi_ref[tf, :, 0:G3], gh[:, 0:G3], h_f),
                            h_f)                                 # frozen past seq end
            out_ref[tf, :, 0:H] = jnp.where(m_f, h_f, 0.0)       # pad positions -> 0

            # ---- backward direction, step tb (independent: fills VLIW slots) ----
            m_b = lens > tb
            h_b = jnp.where(m_b,
                            gru_gates(gi_ref[tb, :, G3:2 * G3], gh[:, G3:2 * G3], h_b),
                            h_b)
            out_ref[tb, :, H:2 * H] = jnp.where(m_b, h_b, 0.0)
            return (h_f, h_b)

        # Dynamic trip count: timesteps beyond the tile's max length are skipped
        # entirely (no MXU/EUP work).  No unroll -> no vreg spills at large Bb*H.
        h_f, h_b = lax.fori_loop(0, lmax, body, (h0_ref[0], h0_ref[1]))
        hid_ref[0] = h_f
        hid_ref[1] = h_b

    return kernel


def init_encoder_params(key, input_dim, emb_dim, enc_hid_dim, dec_hid_dim):
    H = enc_hid_dim
    ks = jax.random.split(key, 12)
    bound = 1.0 / jnp.sqrt(jnp.float32(H))
    u = lambda k, shape: jax.random.uniform(k, shape, jnp.float32, -bound, bound)
    return dict(
        embedding=jax.random.normal(ks[0], (input_dim, emb_dim), jnp.float32),
        w_ih_f=u(ks[1], (3 * H, emb_dim)), w_hh_f=u(ks[2], (3 * H, H)),
        b_ih_f=u(ks[3], (3 * H,)),        b_hh_f=u(ks[4], (3 * H,)),
        w_ih_b=u(ks[5], (3 * H, emb_dim)), w_hh_b=u(ks[6], (3 * H, H)),
        b_ih_b=u(ks[7], (3 * H,)),        b_hh_b=u(ks[8], (3 * H,)),
        # fc / dropout exist in __init__ but are unused by forward(); kept for parity.
        fc_w=u(ks[9], (dec_hid_dim, 2 * H)), fc_b=u(ks[10], (dec_hid_dim,)),
    )


def encoder_forward(params, iput, hidden, lengths, max_len=None):
    """Mirrors Encoder.forward(iput, hidden, lengths); iput is (B, T) int ids."""
    emb_table = params['embedding']
    input_dim, E = emb_table.shape
    H = params['w_hh_f'].shape[1]
    B, T = iput.shape

    num_tc, vmem_cap = _tpu_topology()
    Tp = _round_up(T, 8)
    Bp, Bb, vmem_limit = _pick_tiling(B, Tp, E, H, num_tc, vmem_cap)
    nb = Bp // Bb

    # masked_fill(iput > num_embeddings, 3): '>' (not '>=') mirrors the original
    # module, so ids == input_dim still reach the gather; take(mode='clip')
    # clamps them (torch would raise) -- documented off-by-one kept for parity.
    ids = jnp.where(iput > input_dim, 3, iput).astype(jnp.int32)
    ids = jnp.pad(ids, ((0, Bp - B), (0, Tp - T)))
    # TODO(synk): the data-dependent embedding gather stays in the wrapper (XLA);
    # it has no rectangular BlockSpec form.  bf16 halves its HBM->VMEM traffic.
    emb = jnp.take(emb_table, ids.T, axis=0, mode='clip').astype(jnp.bfloat16)  # (Tp,Bp,E)

    lens = jnp.pad(lengths.astype(jnp.int32), (0, Bp - B))
    tile_lmax = lens.reshape(nb, Bb).max(axis=1).astype(jnp.int32)     # (nb,) per-tile max
    lens2d = lens.reshape(Bp, 1)

    h0 = jnp.pad(hidden.astype(jnp.float32), ((0, 0), (0, Bp - B), (0, 0)))    # (2, Bp, H)

    # MXU operands in bf16; biases stay f32.  W_ih: fwd|bwd gates side by side.
    # W_hh: block-diagonal so one (Bb, 2H) @ (2H, 6H) push serves both directions.
    w_ih = jnp.concatenate([params['w_ih_f'].T, params['w_ih_b'].T],
                           axis=1).astype(jnp.bfloat16)                         # (E, 6H)
    b_ih = jnp.concatenate([params['b_ih_f'], params['b_ih_b']])[None, :]
    b_ih = b_ih.astype(jnp.float32)                                             # (1, 6H)
    zH = jnp.zeros((H, 3 * H), jnp.float32)
    w_hh = jnp.concatenate(
        [jnp.concatenate([params['w_hh_f'].T, zH], axis=1),
         jnp.concatenate([zH, params['w_hh_b'].T], axis=1)],
        axis=0).astype(jnp.bfloat16)                                            # (2H, 6H)
    b_hh = jnp.concatenate([params['b_hh_f'], params['b_hh_b']])[None, :]
    b_hh = b_hh.astype(jnp.float32)                                             # (1, 6H)

    kernel = _make_gru_kernel(Tp, Bb, E, H)
    grid_spec = pltpu.PrefetchScalarGridSpec(
        num_scalar_prefetch=1,                      # per-tile max length -> SMEM
        grid=(nb,),
        in_specs=[
            pl.BlockSpec((Tp, Bb, E), lambda i, lm: (0, i, 0)),       # embedded input
            pl.BlockSpec((Bb, 1), lambda i, lm: (i, 0)),              # lengths
            pl.BlockSpec((2, Bb, H), lambda i, lm: (0, i, 0)),        # initial hidden
            pl.BlockSpec((E, 6 * H), lambda i, lm: (0, 0)),           # W_ih (both dirs)
            pl.BlockSpec((1, 6 * H), lambda i, lm: (0, 0)),           # b_ih
            pl.BlockSpec((2 * H, 6 * H), lambda i, lm: (0, 0)),       # W_hh block-diag
            pl.BlockSpec((1, 6 * H), lambda i, lm: (0, 0)),           # b_hh
        ],
        out_specs=[
            pl.BlockSpec((Tp, Bb, 2 * H), lambda i, lm: (0, i, 0)),   # interleaved out
            pl.BlockSpec((2, Bb, H), lambda i, lm: (0, i, 0)),        # final hiddens
        ],
        scratch_shapes=[pltpu.VMEM((Tp, Bb, 6 * H), jnp.float32)],    # hoisted gi
    )
    out_pad, hid_pad = pl.pallas_call(
        kernel,
        out_shape=(jax.ShapeDtypeStruct((Tp, Bp, 2 * H), jnp.float32),
                   jax.ShapeDtypeStruct((2, Bp, H), jnp.float32)),
        grid_spec=grid_spec,
        compiler_params=pltpu.CompilerParams(
            dimension_semantics=("parallel",),      # batch tiles -> both TCs on v7x
            vmem_limit_bytes=vmem_limit),
    )(tile_lmax, emb, lens2d, h0, w_ih, b_ih, w_hh, b_hh)

    # batch_first output; drop batch/time padding (pad_packed_sequence trims to
    # the longest sequence).  Pass max_len explicitly to stay host-sync free.
    if max_len is None:
        max_len = int(jnp.max(lengths))   # host sync; avoid in jitted production paths
    output = jnp.transpose(out_pad[:max_len, :B], (1, 0, 2))    # (B, max_len, 2H)
    new_hidden = hid_pad[:, :B]                                  # (2, B, H)
    return output, new_hidden


def encoder_forward_ref(params, iput, hidden, lengths):
    """Pure-JAX reference (lax.scan), untrimmed (B, T, 2H) output.  Matmul
    operands are cast to bf16 with f32 accumulation, mirroring the kernel's MXU
    dtype; all other math is f32."""
    input_dim, _ = params['embedding'].shape
    H = params['w_hh_f'].shape[1]
    B, T = iput.shape
    ids = jnp.where(iput > input_dim, 3, iput)
    emb = jnp.take(params['embedding'], ids, axis=0, mode='clip').astype(jnp.float32)
    mask = (jnp.arange(T)[None, :] < lengths[:, None]).astype(jnp.float32)

    def cell(x, h, w_ih, w_hh, b_ih, b_hh):
        gi = jnp.dot(x.astype(jnp.bfloat16), w_ih.T.astype(jnp.bfloat16),
                     preferred_element_type=jnp.float32) + b_ih
        gh = jnp.dot(h.astype(jnp.bfloat16), w_hh.T.astype(jnp.bfloat16),
                     preferred_element_type=jnp.float32) + b_hh
        r = jax.nn.sigmoid(gi[:, :H] + gh[:, :H])
        z = jax.nn.sigmoid(gi[:, H:2 * H] + gh[:, H:2 * H])
        n = jnp.tanh(gi[:, 2 * H:] + r * gh[:, 2 * H:])
        return (1.0 - z) * n + z * h

    def fwd(h, t):
        hn = cell(emb[:, t], h, params['w_ih_f'], params['w_hh_f'],
                  params['b_ih_f'], params['b_hh_f'])
        m = mask[:, t][:, None]
        h = m * hn + (1.0 - m) * h
        return h, m * h

    def bwd(h, t):
        hn = cell(emb[:, t], h, params['w_ih_b'], params['w_hh_b'],
                  params['b_ih_b'], params['b_hh_b'])
        m = mask[:, t][:, None]
        h = m * hn + (1.0 - m) * h
        return h, m * h

    h_f, outs_f = lax.scan(fwd, hidden[0], jnp.arange(T))
    h_b, outs_b = lax.scan(bwd, hidden[1], jnp.arange(T - 1, -1, -1))
    outs_b = outs_b[::-1]
    output = jnp.transpose(jnp.concatenate([outs_f, outs_b], axis=-1), (1, 0, 2))
    return output, jnp.stack([h_f, h_b], axis=0)


if __name__ == "__main__":
    input_dim, emb_dim, enc_hid_dim, dec_hid_dim, dropout = 50, 16, 32, 32, 0.1
    B, T = 2, 8

    key = jax.random.PRNGKey(0)
    kp, ki = jax.random.split(key)
    params = init_encoder_params(kp, input_dim, emb_dim, enc_hid_dim, dec_hid_dim)

    # Token ids, some deliberately > input_dim to exercise masked_fill(..., 3)
    iput = jax.random.randint(ki, (B, T), 0, 2 * input_dim, dtype=jnp.int32)
    lengths_list = [T, T - 3]                      # sorted descending (pack_padded_sequence)
    lengths = jnp.array(lengths_list, dtype=jnp.int32)
    max_len = max(lengths_list)                    # host-side static -> no device sync
    hidden = jnp.zeros((2, B, enc_hid_dim), jnp.float32)   # Encoder.init_hidden(batch_size)

    out, hid = encoder_forward(params, iput, hidden, lengths, max_len=max_len)
    jax.block_until_ready((out, hid))

    out_ref, hid_r = encoder_forward_ref(params, iput, hidden, lengths)
    assert out.shape == (B, max_len, 2 * enc_hid_dim)
    assert hid.shape == (2, B, enc_hid_dim)
    # Both kernel and reference use bf16 MXU operands with f32 accumulation, so
    # remaining differences are only accumulation order -> tight-ish tolerance.
    assert jnp.allclose(out, out_ref[:, :max_len], atol=1e-3, rtol=1e-3)
    assert jnp.allclose(hid, hid_r, atol=1e-3, rtol=1e-3)

    print("KERNEL_OK")
</pallas_src>

<mosaic_0001>
module attributes {stable_mosaic.version = 11 : i64} {
  func.func @kernel(%arg0: i32, %arg1: memref<1xi32, #tpu.memory_space<smem>>, %arg2: memref<8x16x16xbf16, #tpu.memory_space<vmem>>, %arg3: memref<16x1xi32, #tpu.memory_space<vmem>>, %arg4: memref<2x16x32xf32, #tpu.memory_space<vmem>>, %arg5: memref<16x192xbf16, #tpu.memory_space<vmem>>, %arg6: memref<1x192xf32, #tpu.memory_space<vmem>>, %arg7: memref<64x192xbf16, #tpu.memory_space<vmem>>, %arg8: memref<1x192xf32, #tpu.memory_space<vmem>>, %arg9: memref<8x16x64xf32, #tpu.memory_space<vmem>>, %arg10: memref<2x16x32xf32, #tpu.memory_space<vmem>>, %arg11: memref<8x16x192xf32, #tpu.memory_space<vmem>>) attributes {dimension_semantics = [#tpu.dimension_semantics<parallel>], iteration_bounds = array<i64: 1>, scalar_prefetch = 1 : i64, scratch_operands = 1 : i64, tpu.core_type = #tpu.core_type<tc>, window_params = [{transform_indices = @transform_0, window_bounds = array<i64: 8, 16, 16>}, {transform_indices = @transform_1, window_bounds = array<i64: 16, 1>}, {transform_indices = @transform_2, window_bounds = array<i64: 2, 16, 32>}, {pipeline_mode = #tpu.pipeline_mode<synchronous>, transform_indices = @transform_3, window_bounds = array<i64: 16, 192>}, {pipeline_mode = #tpu.pipeline_mode<synchronous>, transform_indices = @transform_4, window_bounds = array<i64: 1, 192>}, {pipeline_mode = #tpu.pipeline_mode<synchronous>, transform_indices = @transform_5, window_bounds = array<i64: 64, 192>}, {pipeline_mode = #tpu.pipeline_mode<synchronous>, transform_indices = @transform_6, window_bounds = array<i64: 1, 192>}, {transform_indices = @transform_7, window_bounds = array<i64: 8, 16, 64>}, {transform_indices = @transform_8, window_bounds = array<i64: 2, 16, 32>}]} {
    %c0 = arith.constant 0 : index
    %c0_0 = arith.constant 0 : index
    %c0_1 = arith.constant 0 : index
    %0 = vector.load %arg2[%c0, %c0_0, %c0_1] : memref<8x16x16xbf16, #tpu.memory_space<vmem>>, vector<8x16x16xbf16>
    %1 = vector.shape_cast %0 : vector<8x16x16xbf16> to vector<128x16xbf16>
    %c0_2 = arith.constant 0 : index
    %c0_3 = arith.constant 0 : index
    %2 = vector.load %arg5[%c0_2, %c0_3] : memref<16x192xbf16, #tpu.memory_space<vmem>>, vector<16x192xbf16>
    %cst = arith.constant dense<0.000000e+00> : vector<128x192xf32>
    %3 = tpu.matmul %1, %2, %cst {dimension_numbers = #tpu.dot_dimension_numbers<[1], [0], [0], [1], [0, 0, 1, 1], [], []>} : vector<128x16xbf16>, vector<16x192xbf16>, vector<128x192xf32> -> vector<128x192xf32>
    %c0_4 = arith.constant 0 : index
    %c0_5 = arith.constant 0 : index
    %4 = vector.load %arg6[%c0_4, %c0_5] : memref<1x192xf32, #tpu.memory_space<vmem>>, vector<1x192xf32>
    %5 = vector.broadcast %4 : vector<1x192xf32> to vector<128x192xf32>
    %6 = arith.addf %3, %5 : vector<128x192xf32>
    %7 = vector.shape_cast %6 : vector<128x192xf32> to vector<8x16x192xf32>
    %c0_6 = arith.constant 0 : index
    %c0_7 = arith.constant 0 : index
    %c0_8 = arith.constant 0 : index
    %8 = vector.load %arg11[%c0_6, %c0_7, %c0_8] : memref<8x16x192xf32, #tpu.memory_space<vmem>>, vector<8x16x192xf32>
    tpu.vector_store %arg11[%c0_6, %c0_7, %c0_8], %7 {strides = array<i32>} : memref<8x16x192xf32, #tpu.memory_space<vmem>>, vector<8x16x192xf32>,
    %c0_9 = arith.constant 0 : index
    %c0_10 = arith.constant 0 : index
    %9 = vector.load %arg3[%c0_9, %c0_10] : memref<16x1xi32, #tpu.memory_space<vmem>>, vector<16x1xi32>
    %c0_11 = arith.constant 0 : index
    %c0_12 = arith.constant 0 : index
    %10 = vector.load %arg7[%c0_11, %c0_12] : memref<64x192xbf16, #tpu.memory_space<vmem>>, vector<64x192xbf16>
    %c0_13 = arith.constant 0 : index
    %c0_14 = arith.constant 0 : index
    %11 = vector.load %arg8[%c0_13, %c0_14] : memref<1x192xf32, #tpu.memory_space<vmem>>, vector<1x192xf32>
    %12 = arith.index_cast %arg0 : i32 to index
    %13 = memref.load %arg1[%12] : memref<1xi32, #tpu.memory_space<smem>>
    %cst_15 = arith.constant 0.000000e+00 : f32
    %14 = vector.broadcast %cst_15 : f32 to vector<16x64xf32>
    %c0_i32 = arith.constant 0 : i32
    %c8_i32 = arith.constant 8 : i32
    %15 = arith.subi %c8_i32, %13 : i32
    %16 = arith.addi %13, %15 : i32
    %c1_i32 = arith.constant 1 : i32
    scf.for %arg12 = %13 to %16 step %c1_i32  : i32 {
      %30 = arith.index_cast %arg12 : i32 to index
      %c0_29 = arith.constant 0 : index
      %c0_30 = arith.constant 0 : index
      %31 = vector.load %arg9[%30, %c0_29, %c0_30] : memref<8x16x64xf32, #tpu.memory_space<vmem>>, vector<1x16x64xf32>
      %32 = vector.shape_cast %31 : vector<1x16x64xf32> to vector<16x64xf32>
      %33 = vector.shape_cast %14 : vector<16x64xf32> to vector<1x16x64xf32>
      tpu.vector_store %arg9[%30, %c0_29, %c0_30], %33 {strides = array<i32>} : memref<8x16x64xf32, #tpu.memory_space<vmem>>, vector<1x16x64xf32>,
    }
    %c0_16 = arith.constant 0 : index
    %c0_17 = arith.constant 0 : index
    %c0_18 = arith.constant 0 : index
    %17 = vector.load %arg4[%c0_16, %c0_17, %c0_18] : memref<2x16x32xf32, #tpu.memory_space<vmem>>, vector<1x16x32xf32>
    %18 = vector.shape_cast %17 : vector<1x16x32xf32> to vector<16x32xf32>
    %c1 = arith.constant 1 : index
    %c0_19 = arith.constant 0 : index
    %c0_20 = arith.constant 0 : index
    %19 = vector.load %arg4[%c1, %c0_19, %c0_20] : memref<2x16x32xf32, #tpu.memory_space<vmem>>, vector<1x16x32xf32>
    %20 = vector.shape_cast %19 : vector<1x16x32xf32> to vector<16x32xf32>
    %c0_i32_21 = arith.constant 0 : i32
    %21 = arith.subi %13, %c0_i32_21 : i32
    %22 = arith.addi %c0_i32_21, %21 : i32
    %c1_i32_22 = arith.constant 1 : i32
    %23:2 = scf.for %arg12 = %c0_i32_21 to %22 step %c1_i32_22 iter_args(%arg13 = %18, %arg14 = %20) -> (vector<16x32xf32>, vector<16x32xf32>)  : i32 {
      %c1_i32_29 = arith.constant 1 : i32
      %30 = arith.subi %13, %c1_i32_29 : i32
      %31 = arith.subi %30, %arg12 : i32
      %32 = tpu.concatenate %arg13, %arg14 in 1 : vector<16x32xf32>, vector<16x32xf32> -> vector<16x64xf32>
      %33 = arith.truncf %32 : vector<16x64xf32> to vector<16x64xbf16>
      %cst_30 = arith.constant dense<0.000000e+00> : vector<16x192xf32>
      %34 = tpu.matmul %33, %10, %cst_30 {dimension_numbers = #tpu.dot_dimension_numbers<[1], [0], [0], [1], [0, 0, 1, 1], [], []>} : vector<16x64xbf16>, vector<64x192xbf16>, vector<16x192xf32> -> vector<16x192xf32>
      %35 = vector.broadcast %11 : vector<1x192xf32> to vector<16x192xf32>
      %36 = arith.addf %34, %35 : vector<16x192xf32>
      %37 = vector.broadcast %arg12 : i32 to vector<16x1xi32>
      %38 = arith.cmpi sgt, %9, %37 : vector<16x1xi32>
      %39 = arith.index_cast %arg12 : i32 to index
      %c0_31 = arith.constant 0 : index
      %c0_32 = arith.constant 0 : index
      %40 = vector.load %arg11[%39, %c0_31, %c0_32] : memref<8x16x192xf32, #tpu.memory_space<vmem>>, vector<1x16x96xf32>
      %41 = vector.shape_cast %40 : vector<1x16x96xf32> to vector<16x96xf32>
      %42 = vector.extract_strided_slice %36 {offsets = [0, 0], sizes = [16, 96], strides = [1, 1]} : vector<16x192xf32> to vector<16x96xf32>
      %43 = vector.extract_strided_slice %41 {offsets = [0, 0], sizes = [16, 32], strides = [1, 1]} : vector<16x96xf32> to vector<16x32xf32>
      %44 = vector.extract_strided_slice %42 {offsets = [0, 0], sizes = [16, 32], strides = [1, 1]} : vector<16x96xf32> to vector<16x32xf32>
      %45 = arith.addf %43, %44 : vector<16x32xf32>
      %46 = arith.negf %45 : vector<16x32xf32>
      %47 = math.exp %46 : vector<16x32xf32>
      %cst_33 = arith.constant 1.000000e+00 : f32
      %48 = vector.broadcast %cst_33 : f32 to vector<16x32xf32>
      %49 = arith.addf %48, %47 : vector<16x32xf32>
      %50 = arith.divf %48, %49 : vector<16x32xf32>
      %51 = vector.extract_strided_slice %41 {offsets = [0, 32], sizes = [16, 32], strides = [1, 1]} : vector<16x96xf32> to vector<16x32xf32>
      %52 = vector.extract_strided_slice %42 {offsets = [0, 32], sizes = [16, 32], strides = [1, 1]} : vector<16x96xf32> to vector<16x32xf32>
      %53 = arith.addf %51, %52 : vector<16x32xf32>
      %54 = arith.negf %53 : vector<16x32xf32>
      %55 = math.exp %54 : vector<16x32xf32>
      %cst_34 = arith.constant 1.000000e+00 : f32
      %56 = vector.broadcast %cst_34 : f32 to vector<16x32xf32>
      %57 = arith.addf %56, %55 : vector<16x32xf32>
      %58 = arith.divf %56, %57 : vector<16x32xf32>
      %59 = vector.extract_strided_slice %41 {offsets = [0, 64], sizes = [16, 32], strides = [1, 1]} : vector<16x96xf32> to vector<16x32xf32>
      %60 = vector.extract_strided_slice %42 {offsets = [0, 64], sizes = [16, 32], strides = [1, 1]} : vector<16x96xf32> to vector<16x32xf32>
      %61 = arith.mulf %50, %60 : vector<16x32xf32>
      %62 = arith.addf %59, %61 : vector<16x32xf32>
      %63 = math.tanh %62 : vector<16x32xf32>
      %cst_35 = arith.constant 1.000000e+00 : f32
      %64 = vector.broadcast %cst_35 : f32 to vector<16x32xf32>
      %65 = arith.subf %64, %58 : vector<16x32xf32>
      %66 = arith.mulf %65, %63 : vector<16x32xf32>
      %67 = arith.mulf %58, %arg13 : vector<16x32xf32>
      %68 = arith.addf %66, %67 : vector<16x32xf32>
      %69 = vector.shape_cast %38 : vector<16x1xi1> to vector<16x1xi1>
      %70 = vector.broadcast %69 : vector<16x1xi1> to vector<16x32xi1>
      %71 = arith.select %70, %68, %arg13 : vector<16x32xi1>, vector<16x32xf32>
      %cst_36 = arith.constant 0.000000e+00 : f32
      %72 = vector.shape_cast %38 : vector<16x1xi1> to vector<16x1xi1>
      %73 = vector.broadcast %72 : vector<16x1xi1> to vector<16x32xi1>
      %74 = vector.broadcast %cst_36 : f32 to vector<16x32xf32>
      %75 = arith.select %73, %71, %74 : vector<16x32xi1>, vector<16x32xf32>
      %76 = arith.index_cast %arg12 : i32 to index
      %c0_37 = arith.constant 0 : index
      %c0_38 = arith.constant 0 : index
      %77 = vector.load %arg9[%76, %c0_37, %c0_38] : memref<8x16x64xf32, #tpu.memory_space<vmem>>, vector<1x16x32xf32>
      %78 = vector.shape_cast %77 : vector<1x16x32xf32> to vector<16x32xf32>
      %79 = vector.shape_cast %75 : vector<16x32xf32> to vector<1x16x32xf32>
      tpu.vector_store %arg9[%76, %c0_37, %c0_38], %79 {strides = array<i32>} : memref<8x16x64xf32, #tpu.memory_space<vmem>>, vector<1x16x32xf32>,
      %80 = vector.broadcast %31 : i32 to vector<16x1xi32>
      %81 = arith.cmpi sgt, %9, %80 : vector<16x1xi32>
      %82 = arith.index_cast %31 : i32 to index
      %c0_39 = arith.constant 0 : index
      %c96 = arith.constant 96 : index
      %83 = vector.load %arg11[%82, %c0_39, %c96] : memref<8x16x192xf32, #tpu.memory_space<vmem>>, vector<1x16x96xf32>
      %84 = vector.shape_cast %83 : vector<1x16x96xf32> to vector<16x96xf32>
      %85 = vector.extract_strided_slice %36 {offsets = [0, 96], sizes = [16, 96], strides = [1, 1]} : vector<16x192xf32> to vector<16x96xf32>
      %86 = vector.extract_strided_slice %84 {offsets = [0, 0], sizes = [16, 32], strides = [1, 1]} : vector<16x96xf32> to vector<16x32xf32>
      %87 = vector.extract_strided_slice %85 {offsets = [0, 0], sizes = [16, 32], strides = [1, 1]} : vector<16x96xf32> to vector<16x32xf32>
      %88 = arith.addf %86, %87 : vector<16x32xf32>
      %89 = arith.negf %88 : vector<16x32xf32>
      %90 = math.exp %89 : vector<16x32xf32>
      %cst_40 = arith.constant 1.000000e+00 : f32
      %91 = vector.broadcast %cst_40 : f32 to vector<16x32xf32>
      %92 = arith.addf %91, %90 : vector<16x32xf32>
      %93 = arith.divf %91, %92 : vector<16x32xf32>
      %94 = vector.extract_strided_slice %84 {offsets = [0, 32], sizes = [16, 32], strides = [1, 1]} : vector<16x96xf32> to vector<16x32xf32>
      %95 = vector.extract_strided_slice %85 {offsets = [0, 32], sizes = [16, 32], strides = [1, 1]} : vector<16x96xf32> to vector<16x32xf32>
      %96 = arith.addf %94, %95 : vector<16x32xf32>
      %97 = arith.negf %96 : vector<16x32xf32>
      %98 = math.exp %97 : vector<16x32xf32>
      %cst_41 = arith.constant 1.000000e+00 : f32
      %99 = vector.broadcast %cst_41 : f32 to vector<16x32xf32>
      %100 = arith.addf %99, %98 : vector<16x32xf32>
      %101 = arith.divf %99, %100 : vector<16x32xf32>
      %102 = vector.extract_strided_slice %84 {offsets = [0, 64], sizes = [16, 32], strides = [1, 1]} : vector<16x96xf32> to vector<16x32xf32>
      %103 = vector.extract_strided_slice %85 {offsets = [0, 64], sizes = [16, 32], strides = [1, 1]} : vector<16x96xf32> to vector<16x32xf32>
      %104 = arith.mulf %93, %103 : vector<16x32xf32>
      %105 = arith.addf %102, %104 : vector<16x32xf32>
      %106 = math.tanh %105 : vector<16x32xf32>
      %cst_42 = arith.constant 1.000000e+00 : f32
      %107 = vector.broadcast %cst_42 : f32 to vector<16x32xf32>
      %108 = arith.subf %107, %101 : vector<16x32xf32>
      %109 = arith.mulf %108, %106 : vector<16x32xf32>
      %110 = arith.mulf %101, %arg14 : vector<16x32xf32>
      %111 = arith.addf %109, %110 : vector<16x32xf32>
      %112 = vector.shape_cast %81 : vector<16x1xi1> to vector<16x1xi1>
      %113 = vector.broadcast %112 : vector<16x1xi1> to vector<16x32xi1>
      %114 = arith.select %113, %111, %arg14 : vector<16x32xi1>, vector<16x32xf32>
      %cst_43 = arith.constant 0.000000e+00 : f32
      %115 = vector.shape_cast %81 : vector<16x1xi1> to vector<16x1xi1>
      %116 = vector.broadcast %115 : vector<16x1xi1> to vector<16x32xi1>
      %117 = vector.broadcast %cst_43 : f32 to vector<16x32xf32>
      %118 = arith.select %116, %114, %117 : vector<16x32xi1>, vector<16x32xf32>
      %119 = arith.index_cast %31 : i32 to index
      %c0_44 = arith.constant 0 : index
      %c32 = arith.constant 32 : index
      %120 = vector.load %arg9[%119, %c0_44, %c32] : memref<8x16x64xf32, #tpu.memory_space<vmem>>, vector<1x16x32xf32>
      %121 = vector.shape_cast %120 : vector<1x16x32xf32> to vector<16x32xf32>
      %122 = vector.shape_cast %118 : vector<16x32xf32> to vector<1x16x32xf32>
      tpu.vector_store %arg9[%119, %c0_44, %c32], %122 {strides = array<i32>} : memref<8x16x64xf32, #tpu.memory_space<vmem>>, vector<1x16x32xf32>,
      scf.yield %71, %114 : vector<16x32xf32>, vector<16x32xf32>
    }
    %c0_23 = arith.constant 0 : index
    %c0_24 = arith.constant 0 : index
    %c0_25 = arith.constant 0 : index
    %24 = vector.load %arg10[%c0_23, %c0_24, %c0_25] : memref<2x16x32xf32, #tpu.memory_space<vmem>>, vector<1x16x32xf32>
    %25 = vector.shape_cast %24 : vector<1x16x32xf32> to vector<16x32xf32>
    %26 = vector.shape_cast %23#0 : vector<16x32xf32> to vector<1x16x32xf32>
    tpu.vector_store %arg10[%c0_23, %c0_24, %c0_25], %26 {strides = array<i32>} : memref<2x16x32xf32, #tpu.memory_space<vmem>>, vector<1x16x32xf32>,
    %c1_26 = arith.constant 1 : index
    %c0_27 = arith.constant 0 : index
    %c0_28 = arith.constant 0 : index
    %27 = vector.load %arg10[%c1_26, %c0_27, %c0_28] : memref<2x16x32xf32, #tpu.memory_space<vmem>>, vector<1x16x32xf32>
    %28 = vector.shape_cast %27 : vector<1x16x32xf32> to vector<16x32xf32>
    %29 = vector.shape_cast %23#1 : vector<16x32xf32> to vector<1x16x32xf32>
    tpu.vector_store %arg10[%c1_26, %c0_27, %c0_28], %29 {strides = array<i32>} : memref<2x16x32xf32, #tpu.memory_space<vmem>>, vector<1x16x32xf32>,
    return
  }
  func.func @transform_0(%arg0: i32, %arg1: memref<1xi32, #tpu.memory_space<smem>>) -> (i32, i32, i32) {
    %c0_i32 = arith.constant 0 : i32
    %c0_i32_0 = arith.constant 0 : i32
    %c0_i32_1 = arith.constant 0 : i32
    return %c0_i32, %arg0, %c0_i32_0 : i32, i32, i32
  }
  func.func @transform_1(%arg0: i32, %arg1: memref<1xi32, #tpu.memory_space<smem>>) -> (i32, i32) {
    %c0_i32 = arith.constant 0 : i32
    %c0_i32_0 = arith.constant 0 : i32
    return %arg0, %c0_i32 : i32, i32
  }
  func.func @transform_2(%arg0: i32, %arg1: memref<1xi32, #tpu.memory_space<smem>>) -> (i32, i32, i32) {
    %c0_i32 = arith.constant 0 : i32
    %c0_i32_0 = arith.constant 0 : i32
    %c0_i32_1 = arith.constant 0 : i32
    return %c0_i32, %arg0, %c0_i32_0 : i32, i32, i32
  }
  func.func @transform_3(%arg0: i32, %arg1: memref<1xi32, #tpu.memory_space<smem>>) -> (i32, i32) {
    %c0_i32 = arith.constant 0 : i32
    %c0_i32_0 = arith.constant 0 : i32
    %c0_i32_1 = arith.constant 0 : i32
    return %c0_i32, %c0_i32_0 : i32, i32
  }
  func.func @transform_4(%arg0: i32, %arg1: memref<1xi32, #tpu.memory_space<smem>>) -> (i32, i32) {
    %c0_i32 = arith.constant 0 : i32
    %c0_i32_0 = arith.constant 0 : i32
    %c0_i32_1 = arith.constant 0 : i32
    return %c0_i32, %c0_i32_0 : i32, i32
  }
  func.func @transform_5(%arg0: i32, %arg1: memref<1xi32, #tpu.memory_space<smem>>) -> (i32, i32) {
    %c0_i32 = arith.constant 0 : i32
    %c0_i32_0 = arith.constant 0 : i32
    %c0_i32_1 = arith.constant 0 : i32
    return %c0_i32, %c0_i32_0 : i32, i32
  }
  func.func @transform_6(%arg0: i32, %arg1: memref<1xi32, #tpu.memory_space<smem>>) -> (i32, i32) {
    %c0_i32 = arith.constant 0 : i32
    %c0_i32_0 = arith.constant 0 : i32
    %c0_i32_1 = arith.constant 0 : i32
    return %c0_i32, %c0_i32_0 : i32, i32
  }
  func.func @transform_7(%arg0: i32, %arg1: memref<1xi32, #tpu.memory_space<smem>>) -> (i32, i32, i32) {
    %c0_i32 = arith.constant 0 : i32
    %c0_i32_0 = arith.constant 0 : i32
    %c0_i32_1 = arith.constant 0 : i32
    return %c0_i32, %arg0, %c0_i32_0 : i32, i32, i32
  }
  func.func @transform_8(%arg0: i32, %arg1: memref<1xi32, #tpu.memory_space<smem>>) -> (i32, i32, i32) {
    %c0_i32 = arith.constant 0 : i32
    %c0_i32_0 = arith.constant 0 : i32
    %c0_i32_1 = arith.constant 0 : i32
    return %c0_i32, %arg0, %c0_i32_0 : i32, i32, i32
  }
}

</mosaic_0001>

<bundles_post_ra>
// kernel: tpu_custom_call.1
= control target key start
LH: loop header
LB: loop body
LE: loop exit
PB: predicated region body
PF: predicated region fallthrough
CT: control target
= control target key end

     0   :  { %16 = vsyncpa [#allocation6], 0  ;;  %s1685_s0 = inlined_call_operand.<no memory space> [shape: s32[1], index: 0, kind: input, shape index: {}]   ;;  %s1686_s1 = inlined_call_operand.hbm [shape: bf16[8,16,16], index: 1, kind: input, shape index: {}]   ;;  %s1687_s2 = inlined_call_operand.vmem [shape: s32[16,1], index: 2, kind: input, shape index: {}]   ;;  %s1688_s3 = inlined_call_operand.hbm [shape: f32[2,16,32], index: 3, kind: input, shape index: {}]   ;;  %s1689_s4 = inlined_call_operand.vmem [shape: bf16[16,192], index: 4, kind: input, shape index: {}]   ;;  %s1690_s5 = inlined_call_operand.vmem [shape: f32[1,192], index: 5, kind: input, shape index: {}]   ;;  %s1691_s6 = inlined_call_operand.hbm [shape: bf16[64,192], index: 6, kind: input, shape index: {}]   ;;  %s1692_s7 = inlined_call_operand.vmem [shape: f32[1,192], index: 7, kind: input, shape index: {}]   ;;  %s1693_s8 = inlined_call_operand.hbm [shape: f32[8,16,64], index: 8, kind: output, shape index: {0}]   ;;  %s1694_s9 = inlined_call_operand.hbm [shape: f32[2,16,32], index: 9, kind: output, shape index: {1}]  }
   0x1   :  { %17 = vsyncpa [#allocation9], 0 }
   0x2   :  { %18 = vsyncpa [#allocation7], 0  ;;  %s39_s11 = sshll.u32 %s1688_s3, 4  ;;  %s40_s11 = int_to_ptr.hbm [resolvable:$true] %s39_s11 }
   0x3   :  { %19 = vsyncpa [#allocation13], 0  ;;  %s1265_s12 = smov [#allocation8]   ;;  %s24_s16 = sshll.u32 %s1686_s1, 4  ;;  %s25_s16 = int_to_ptr.hbm [resolvable:$true] %s24_s16 }
   0x4   :  { %s41_s13 = sshll.u32 %s1265_s12, 4  ;;  %s1266_s17 = smov 128   ;;  %s42_s13 = int_to_ptr.vmem [resolvable:$true] %s41_s13 }
   0x5   :  { %s1267_s18 = smov 8   ;;  %s1268_s19 = smov [#allocation5]  }
   0x6   :  { %47 = dma.hbm_to_vmem [thread:$0]  %s40_s11, 512, %s42_s13, [#allocation9], %s1266_s17, %s1266_s17, %s1267_s18  }
   0x7   :  { %s26_s20 = sshll.u32 %s1268_s19, 4  ;;  %s1269_s3 = smov 64   ;;  %s27_s20 = int_to_ptr.vmem [resolvable:$true] %s26_s20 }
   0x8   :  { %s1270_s21 = smov 4   ;;  %s56_s24 = sshll.u32 %s1691_s6, 4  ;;  %s57_s24 = int_to_ptr.hbm [resolvable:$true] %s56_s24 }
   0x9   :  { %32 = dma.hbm_to_vmem [thread:$0]  %s25_s16, 1024, %s27_s20, [#allocation6], %s1269_s3, %s1269_s3, %s1270_s21  }
   0xa   :  { %s1271_s25 = smov [#allocation10]  }
   0xb   :  { %s58_s1 = sshll.u32 %s1271_s25, 4  ;;  %s59_s1 = int_to_ptr.vmem [resolvable:$true] %s58_s1 }
   0xc   :  { %64 = dma.hbm_to_vmem [thread:$0]  %s57_s24, 1024, %s59_s1, [#allocation9], %s1266_s17, %s1266_s17, %s1267_s18  }
   0xd   :  { %1217 = dma.done.wait [#allocation6], 1024  }
   0xe   :  { %1218 = vsyncadd [#allocation6], 4294966272 }
   0xf   :  { %1219 = dma.done.wait [#allocation9], 1536  }
  0x10   :  { %1220 = vsyncadd [#allocation9], 4294965760  ;;  %v1347_v0 = vld [vmem:[%s1687_s2] sm:$0xff]  ;;  %v1352_v1 = vld [vmem:[%s1687_s2 + $0x8] sm:$0xff]  ;;  %vm154_vm0 = vcmask 130048   ;;  %vm278_vm1 = vcmask 523264  }
  0x11   :  { %v1354_v2 = vld [vmem:[#allocation10 + $0x4] sm:$0xf]  ;;  %v1356_v3 = vld [vmem:[#allocation10] sm:$0xf]  ;;  %v1358_v4 = vld [vmem:[#allocation10 + $0x8] sm:$0xf0] }
  0x12   :  { %v1360_v5 = vld [vmem:[#allocation10 + $0x4] sm:$0xf0]  ;;  %v1362_v6 = vld [vmem:[#allocation10 + $0x14] sm:$0xf]  ;;  %v1364_v7 = vld [vmem:[#allocation10 + $0x10] sm:$0xf] }
  0x13   :  { %v1366_v8 = vld [vmem:[#allocation10 + $0x18] sm:$0xf0]  ;;  %v1368_v9 = vld [vmem:[#allocation10 + $0x14] sm:$0xf0]  ;;  %v1370_v10 = vld [vmem:[#allocation10 + $0x24] sm:$0xf] }
  0x14   :  { %v1372_v11 = vld [vmem:[#allocation10 + $0x20] sm:$0xf]  ;;  %v1374_v12 = vld [vmem:[#allocation10 + $0x28] sm:$0xf0]  ;;  %v1376_v13 = vld [vmem:[#allocation10 + $0x24] sm:$0xf0] }
  0x15   :  { %v1378_v14 = vld [vmem:[#allocation10 + $0x34] sm:$0xf]  ;;  %v1380_v15 = vld [vmem:[#allocation10 + $0x30] sm:$0xf]  ;;  %v1382_v16 = vld [vmem:[#allocation10 + $0x38] sm:$0xf0] }
  0x16   :  { %v1384_v17 = vld [vmem:[#allocation10 + $0x34] sm:$0xf0]  ;;  %v1389_v18 = vld [vmem:[%s1692_s7] sm:$0x3]  ;;  %v910_v20 = vld [vmem:[%s1689_s4 + $0x4] sm:$0xf0] }
  0x17   :  { %v830_v19 = vld [vmem:[%s1689_s4] sm:$0xf]  ;;  %v909_v22 = vld [vmem:[%s1689_s4 + $0x4] sm:$0xf]  ;;  %v832_v23 = vld [vmem:[%s1689_s4 + $0x8] sm:$0xf0] }
  0x18   :  { %v831_v21 = vor.u32 %v910_v20, %v830_v19  ;;  %v835_v24 = vor.u32 %v909_v22, %v832_v23  ;;  %v901_v25 = vld [vmem:[#allocation5] sm:$0xff]  ;;  %v902_v27 = vld [vmem:[#allocation5 + $0x8] sm:$0xff]  ;;  %v903_v29 = vld [vmem:[#allocation5 + $0x10] sm:$0xff]  ;;  %p775_p0 = scmp.ge.s32.totalorder %s1685_s0, 8 }
  0x19   :  { %v905_v26 = vld [vmem:[#allocation5 + $0x20] sm:$0xff]  ;;  %v906_v28 = vld [vmem:[#allocation5 + $0x28] sm:$0xff]  ;;  %v907_v30 = vld [vmem:[#allocation5 + $0x30] sm:$0xff]  ;;  %s1225_s21 = smov (!%p775_p0), %s1685_s0  }
  0x1a   :  { %186 = vmatpush.bf16.msra.mxu0 %v831_v21  ;;  %921 = vmatpush.bf16.msra.mxu2 %v831_v21  ;;  %v904_v31 = vld [vmem:[#allocation5 + $0x18] sm:$0xff]  ;;  %v98_v33 = vld [vmem:[%s1690_s5] sm:$0x3] }
  0x1b   :  { %235 = vmatpush.bf16.msra.mxu1 %v835_v24  ;;  %922 = vmatpush.bf16.msra.mxu3 %v835_v24  ;;  %v908_v32 = vld [vmem:[#allocation5 + $0x38] sm:$0xff]  ;;  %v1422_v34 = vperm.slane %v98_v33, 0  ;;  %v1424_v35 = vperm.slane %v98_v33, 1 }
  0x1d   :  { %836 = vmatmul.msk.bf16.vlgmr.msra.gmra.mxu0 %vm154_vm0, %v901_v25  ;;  %840 = vmatmul.msk.bf16.vlgmr.msra.gmra.mxu2 %vm154_vm0, %v905_v26 }
  0x1e   :  { %844 = vmatmul.msk.bf16.vlgmr.msra.gmra.mxu1 %vm154_vm0, %v901_v25  ;;  %848 = vmatmul.msk.bf16.vlgmr.msra.gmra.mxu3 %vm154_vm0, %v905_v26 }
  0x2d   :  { %837 = vmatmul.msk.bf16.gmra.mxu0 %vm154_vm0, %v902_v27  ;;  %841 = vmatmul.msk.bf16.gmra.mxu2 %vm154_vm0, %v906_v28 }
  0x2e   :  { %845 = vmatmul.msk.bf16.gmra.mxu1 %vm154_vm0, %v902_v27  ;;  %849 = vmatmul.msk.bf16.gmra.mxu3 %vm154_vm0, %v906_v28 }
  0x3d   :  { %838 = vmatmul.msk.bf16.gmra.mxu0 %vm154_vm0, %v903_v29  ;;  %842 = vmatmul.msk.bf16.gmra.mxu2 %vm154_vm0, %v907_v30 }
  0x3e   :  { %846 = vmatmul.msk.bf16.gmra.mxu1 %vm154_vm0, %v903_v29  ;;  %850 = vmatmul.msk.bf16.gmra.mxu3 %vm154_vm0, %v907_v30 }
  0x4d   :  { %839 = vmatmul.msk.bf16.gmra.mxu0 %vm154_vm0, %v904_v31  ;;  %843 = vmatmul.msk.bf16.gmra.mxu2 %vm154_vm0, %v908_v32 }
  0x4e   :  { %847 = vmatmul.msk.bf16.gmra.mxu1 %vm154_vm0, %v904_v31  ;;  %851 = vmatmul.msk.bf16.gmra.mxu3 %vm154_vm0, %v908_v32 }
  0x9a   :  { %v188_v36 = vpop.f32.mrf.mxu0 }
  0x9b   :  { %v189_v37 = vadd.f32 %v188_v36, %v1422_v34  ;;  %v237_v38 = vpop.f32.mrf.mxu1 }
  0x9c   :  { %v238_v39 = vadd.f32 %v237_v38, %v1424_v35 }
  0x9d   :  { %277 = vst [vmem:[#allocation2] sm:$0xff] %v189_v37 }
  0x9e   :  { %279 = vst.msk [vmem:[#allocation2 + $0x8] sm:$0xff] %vm278_vm1, %v238_v39 }
  0xa0   :  { %v208_v40 = vpop.f32.mrf.mxu2 }
  0xa1   :  { %v209_v41 = vadd.f32 %v208_v40, %v1422_v34  ;;  %v257_v42 = vpop.f32.mrf.mxu3 }
  0xa2   :  { %v258_v43 = vadd.f32 %v257_v42, %v1424_v35  ;;  %v190_v44 = vpop.f32.mrf.mxu0 }
  0xa3   :  { %294 = vst [vmem:[#allocation2 + $0x80] sm:$0xff] %v209_v41  ;;  %v191_v45 = vadd.f32 %v190_v44, %v1422_v34  ;;  %v239_v46 = vpop.f32.mrf.mxu1 }
  0xa4   :  { %295 = vst.msk [vmem:[#allocation2 + $0x88] sm:$0xff] %vm278_vm1, %v258_v43  ;;  %v240_v47 = vadd.f32 %v239_v46, %v1424_v35 }
  0xa5   :  { %280 = vst [vmem:[#allocation2 + $0x10] sm:$0xff] %v191_v45 }
  0xa6   :  { %281 = vst.msk [vmem:[#allocation2 + $0x18] sm:$0xff] %vm278_vm1, %v240_v47 }
  0xa8   :  { %v210_v48 = vpop.f32.mrf.mxu2 }
  0xa9   :  { %v211_v49 = vadd.f32 %v210_v48, %v1422_v34  ;;  %v259_v50 = vpop.f32.mrf.mxu3 }
  0xaa   :  { %v260_v51 = vadd.f32 %v259_v50, %v1424_v35  ;;  %v193_v52 = vpop.f32.mrf.mxu0 }
  0xab   :  { %296 = vst [vmem:[#allocation2 + $0x90] sm:$0xff] %v211_v49  ;;  %v194_v53 = vadd.f32 %v193_v52, %v1422_v34  ;;  %v242_v54 = vpop.f32.mrf.mxu1 }
  0xac   :  { %297 = vst.msk [vmem:[#allocation2 + $0x98] sm:$0xff] %vm278_vm1, %v260_v51  ;;  %v243_v55 = vadd.f32 %v242_v54, %v1424_v35 }
  0xad   :  { %282 = vst [vmem:[#allocation2 + $0x20] sm:$0xff] %v194_v53 }
  0xae   :  { %283 = vst.msk [vmem:[#allocation2 + $0x28] sm:$0xff] %vm278_vm1, %v243_v55 }
  0xb0   :  { %v213_v56 = vpop.f32.mrf.mxu2 }
  0xb1   :  { %v214_v57 = vadd.f32 %v213_v56, %v1422_v34  ;;  %v262_v58 = vpop.f32.mrf.mxu3 }
  0xb2   :  { %v263_v59 = vadd.f32 %v262_v58, %v1424_v35  ;;  %v195_v60 = vpop.f32.mrf.mxu0 }
  0xb3   :  { %298 = vst [vmem:[#allocation2 + $0xa0] sm:$0xff] %v214_v57  ;;  %v196_v61 = vadd.f32 %v195_v60, %v1422_v34  ;;  %v244_v62 = vpop.f32.mrf.mxu1 }
  0xb4   :  { %299 = vst.msk [vmem:[#allocation2 + $0xa8] sm:$0xff] %vm278_vm1, %v263_v59  ;;  %v245_v63 = vadd.f32 %v244_v62, %v1424_v35 }
  0xb5   :  { %284 = vst [vmem:[#allocation2 + $0x30] sm:$0xff] %v196_v61 }
  0xb6   :  { %285 = vst.msk [vmem:[#allocation2 + $0x38] sm:$0xff] %vm278_vm1, %v245_v63 }
  0xb8   :  { %v215_v19 = vpop.f32.mrf.mxu2 }
  0xb9   :  { %v216_v20 = vadd.f32 %v215_v19, %v1422_v34  ;;  %v264_v21 = vpop.f32.mrf.mxu3 }
  0xba   :  { %v265_v22 = vadd.f32 %v264_v21, %v1424_v35  ;;  %v198_v23 = vpop.f32.mrf.mxu0 }
  0xbb   :  { %300 = vst [vmem:[#allocation2 + $0xb0] sm:$0xff] %v216_v20  ;;  %v199_v24 = vadd.f32 %v198_v23, %v1422_v34  ;;  %v247_v25 = vpop.f32.mrf.mxu1 }
  0xbc   :  { %301 = vst.msk [vmem:[#allocation2 + $0xb8] sm:$0xff] %vm278_vm1, %v265_v22  ;;  %v248_v26 = vadd.f32 %v247_v25, %v1424_v35 }
  0xbd   :  { %286 = vst [vmem:[#allocation2 + $0x40] sm:$0xff] %v199_v24 }
  0xbe   :  { %287 = vst.msk [vmem:[#allocation2 + $0x48] sm:$0xff] %vm278_vm1, %v248_v26 }
  0xc0   :  { %v218_v27 = vpop.f32.mrf.mxu2 }
  0xc1   :  { %v219_v28 = vadd.f32 %v218_v27, %v1422_v34  ;;  %v267_v29 = vpop.f32.mrf.mxu3 }
  0xc2   :  { %v268_v30 = vadd.f32 %v267_v29, %v1424_v35  ;;  %v200_v31 = vpop.f32.mrf.mxu0 }
  0xc3   :  { %302 = vst [vmem:[#allocation2 + $0xc0] sm:$0xff] %v219_v28  ;;  %v201_v32 = vadd.f32 %v200_v31, %v1422_v34  ;;  %v249_v33 = vpop.f32.mrf.mxu1 }
  0xc4   :  { %303 = vst.msk [vmem:[#allocation2 + $0xc8] sm:$0xff] %vm278_vm1, %v268_v30  ;;  %v250_v36 = vadd.f32 %v249_v33, %v1424_v35 }
  0xc5   :  { %288 = vst [vmem:[#allocation2 + $0x50] sm:$0xff] %v201_v32 }
  0xc6   :  { %289 = vst.msk [vmem:[#allocation2 + $0x58] sm:$0xff] %vm278_vm1, %v250_v36 }
  0xc8   :  { %v220_v37 = vpop.f32.mrf.mxu2 }
  0xc9   :  { %v221_v38 = vadd.f32 %v220_v37, %v1422_v34  ;;  %v269_v39 = vpop.f32.mrf.mxu3 }
  0xca   :  { %v270_v40 = vadd.f32 %v269_v39, %v1424_v35  ;;  %v203_v41 = vpop.f32.mrf.mxu0 }
  0xcb   :  { %304 = vst [vmem:[#allocation2 + $0xd0] sm:$0xff] %v221_v38  ;;  %v204_v42 = vadd.f32 %v203_v41, %v1422_v34  ;;  %v252_v43 = vpop.f32.mrf.mxu1 }
  0xcc   :  { %305 = vst.msk [vmem:[#allocation2 + $0xd8] sm:$0xff] %vm278_vm1, %v270_v40  ;;  %v253_v44 = vadd.f32 %v252_v43, %v1424_v35 }
  0xcd   :  { %290 = vst [vmem:[#allocation2 + $0x60] sm:$0xff] %v204_v42 }
  0xce   :  { %291 = vst.msk [vmem:[#allocation2 + $0x68] sm:$0xff] %vm278_vm1, %v253_v44 }
  0xd0   :  { %v223_v45 = vpop.f32.mrf.mxu2 }
  0xd1   :  { %v224_v46 = vadd.f32 %v223_v45, %v1422_v34  ;;  %v272_v47 = vpop.f32.mrf.mxu3 }
  0xd2   :  { %v273_v48 = vadd.f32 %v272_v47, %v1424_v35  ;;  %v205_v49 = vpop.f32.mrf.mxu0 }
  0xd3   :  { %306 = vst [vmem:[#allocation2 + $0xe0] sm:$0xff] %v224_v46  ;;  %v206_v50 = vadd.f32 %v205_v49, %v1422_v34  ;;  %v254_v51 = vpop.f32.mrf.mxu1 }
  0xd4   :  { %307 = vst.msk [vmem:[#allocation2 + $0xe8] sm:$0xff] %vm278_vm1, %v273_v48  ;;  %v255_v52 = vadd.f32 %v254_v51, %v1424_v35 }
  0xd5   :  { %292 = vst [vmem:[#allocation2 + $0x70] sm:$0xff] %v206_v50 }
  0xd6   :  { %293 = vst.msk [vmem:[#allocation2 + $0x78] sm:$0xff] %vm278_vm1, %v255_v52 }
  0xd8   :  { %v225_v53 = vpop.f32.mrf.mxu2  ;;  %776 = sbr.rel (%p775_p0) target bundleno = 229 (0xe5), region = 83 }
  0xd9   :  { %v226_v54 = vadd.f32 %v225_v53, %v1422_v34  ;;  %v274_v55 = vpop.f32.mrf.mxu3 }
  0xda   :  { %v275_v56 = vadd.f32 %v274_v55, %v1424_v35 }
  0xdb   :  { %308 = vst [vmem:[#allocation2 + $0xf0] sm:$0xff] %v226_v54 }
  0xdc   :  { %309 = vst.msk [vmem:[#allocation2 + $0xf8] sm:$0xff] %vm278_vm1, %v275_v56 }
  0xdd LB: > { %s852_s22 = sshll.u32 %s1227_s21, 4  ;;  %v1272_v34 = vmov 0.0   ;;  %s325_s21 = sadd.s32 1, %s1227_s21   ;;  %s1227_s21 = sphi %s1225_s21, %s325_s21  }
  0xde   : > { %s329_s23 = scalar_lea.vmem [#allocation11], %s852_s22  ;;  %p324_p1 = scmp.ge.s32.totalorder %s325_s21, 8 }
  0xdf   : > { %330 = vst.msk [vmem:[%s329_s23] sm:$0xff] %vm278_vm1, %v1272_v34 }
  0xe0   : > { %331 = vst.msk [vmem:[%s329_s23 + $0x8] sm:$0xff] %vm278_vm1, %v1272_v34  ;;  %327 = sbr.rel (!%p324_p1) target bundleno = 221 (0xdd), region = 89 }
  0xe5 PF:  { %v332_v35 = vld [vmem:[#allocation8] sm:$0xff]   ;;  %v333_v57 = vld [vmem:[#allocation8 + $0x8] sm:$0xff]   ;;  %v335_v58 = vld [vmem:[#allocation8 + $0x10] sm:$0xff]   ;;  %p853_p2 = scmp.le.s32.totalorder %s1685_s0, 0 }
  0xe6   :  { %v336_v59 = vld [vmem:[#allocation8 + $0x18] sm:$0xff]   ;;  %v1696_v61 = vmov %v335_v58  ;;  %v1697_v62 = vmov %v333_v57  ;;  %v1698_v63 = vmov %v332_v35  ;;  %s1501_s1 = smov (!%p853_p2), 0  }
  0xe7   :  { %v1695_v60 = vmov %v336_v59  ;;  %785 = sbr.rel (%p853_p2) target bundleno = 996 (0x3e4), region = 94 }
  0xec LB: > { %v882_v19 = vor.u32 %v1384_v17, %v1380_v15  ;;  %v886_v20 = vor.u32 %v1378_v14, %v1382_v16  ;;  %v1017_v21 = vpack.i.bf16 %v1231_v59, %v1235_v58  ;;  %v874_v22 = vor.u32 %v1376_v13, %v1372_v11  ;;  %s1273_s26 = smov 32   ;;  %s1274_s27 = smov 64   ;;  %s1247_s1 = sphi %s1501_s1, %s340_s1   ;;  %v1243_v35 = vphi %v332_v35, %v1702_v35   ;;  %v1239_v57 = vphi %v333_v57, %v1701_v57   ;;  %v1235_v58 = vphi %v335_v58, %v1700_v58   ;;  %v1231_v59 = vphi %v336_v59, %v1699_v59  }
  0xed   : > { %v878_v23 = vor.u32 %v1370_v10, %v1374_v12  ;;  %v866_v24 = vor.u32 %v1368_v9, %v1364_v7  ;;  %v870_v25 = vor.u32 %v1362_v6, %v1366_v8  ;;  %v858_v26 = vor.u32 %v1360_v5, %v1356_v3  ;;  %s919_s28 = sshll.u32 %s1247_s1, 5  ;;  %s854_s6 = sadd.s32 4294967295, %s1685_s0 }
  0xee   : > { %413 = vmatpush.bf16.msra.mxu0 %v882_v19  ;;  %427 = vmatpush.bf16.msra.mxu1 %v886_v20  ;;  %v862_v27 = vor.u32 %v1354_v2, %v1358_v4  ;;  %vm357_vm2 = vcmask 261120   ;;  %v362_v36 = vperm.slane %v1389_v18, 0  ;;  %v363_v40 = vperm.slane %v1389_v18, 1  ;;  %s442_s30 = scalar_lea.vmem [#allocation2], %s919_s28  ;;  %s1562_s10 = ssub.s32 %s854_s6, %s1247_s1 }
  0xef   : > { %1018 = vrot.lane.b32.xlu0 %v1017_v21, %s1273_s26  ;;  %v1559_v46 = vld [vmem:[%s442_s30] sm:$0xff]  ;;  %s920_s11 = sshll.u32 %s1562_s10, 5  ;;  %v1566_v49 = vld [vmem:[%s442_s30 + $0x10] sm:$0xff]  ;;  %s1276_s13 = smov 96  }
  0xf0   : > { %s1568_s12 = scalar_lea.vmem [#allocation2], %s920_s11  ;;  %s893_s14 = sshll.u32 %s1247_s1, 4 }
  0xf1   : > { %v565_v50 = vld [vmem:[%s1568_s12 + $0x10] sm:$0xff]  ;;  %v563_v54 = vld [vmem:[%s1568_s12] sm:$0xff]  ;;  %s554_s15 = scalar_lea.vmem [#allocation11], %s893_s14  ;;  %s900_s16 = sshll.u32 %s1562_s10, 4 }
  0xf2   : > { %414 = vmatpush.bf16.msra.mxu0 %v874_v22  ;;  %428 = vmatpush.bf16.msra.mxu1 %v878_v23  ;;  %s708_s4 = scalar_lea.vmem [#allocation11], %s900_s16 }
  0xf6   : > { %415 = vmatpush.bf16.msra.mxu0 %v866_v24  ;;  %429 = vmatpush.bf16.msra.mxu1 %v870_v25 }
  0xfa   : > { %416 = vmatpush.bf16.msra.mxu0 %v858_v26  ;;  %430 = vmatpush.bf16.msra.mxu1 %v862_v27 }
 0x161   : > { %v1019_v28 = vpop.permute.xlu0 %1018 }
 0x162   : > { %v1021_v29 = vunpack.i.h.bf16 %v1019_v28  ;;  %v1020_v30 = vunpack.i.l.bf16 %v1019_v28 }
 0x164   : > { %v358_v31 = vsel %vm357_vm2, %v1243_v35, %v1020_v30  ;;  %v359_v32 = vsel %vm357_vm2, %v1239_v57, %v1021_v29 }
 0x165   : > { %v360_v33 = vpack.c.bf16 %v359_v32, %v358_v31 }
 0x167   : > { %887 = vmatmul.msk.bf16.vlgmr.msra.gmra.mxu0 %vm278_vm1, %v360_v33  ;;  %888 = vmatmul.msk.bf16.vlgmr.msra.gmra.mxu1 %vm278_vm1, %v360_v33 }
 0x1e4   : > { %v418_v37 = vpop.f32.mrf.mxu0  ;;  %v432_v38 = vpop.f32.mrf.mxu1 }
 0x1e5   : > { %v419_v39 = vadd.f32 %v418_v37, %v362_v36  ;;  %v1551_v45 = vadd.f32 %v432_v38, %v363_v40 }
 0x1e7   : > { %487 = vrot.lane.b32.xlu0 %v419_v39, %s1274_s27  ;;  %v445_v47 = vadd.f32 %v1559_v46, %v419_v39  ;;  %v567_v34 = vadd.f32 %v563_v54, %v419_v39 }
 0x1e9   : > { %v891_v48 = vmul.f32 -1.442695, %v445_v47  ;;  %v896_v61 = vmul.f32 -1.442695, %v567_v34 }
 0x1eb   : > { %1025 = vpow2.f32 %v891_v48 }
 0x1ec   : > { %v420_v41 = vpop.f32.mrf.mxu0  ;;  %v434_v42 = vpop.f32.mrf.mxu1 }
 0x1ed   : > { %v421_v43 = vadd.f32 %v420_v41, %v362_v36  ;;  %v1546_v44 = vadd.f32 %v434_v42, %v363_v40 }
 0x1ef   : > { %651 = vrot.lane.b32.xlu2 %v1546_v44, %s1274_s27  ;;  %489 = vrot.lane.b32.xlu1 %v421_v43, %s1274_s27  ;;  %v446_v51 = vadd.f32 %v1566_v49, %v421_v43  ;;  %v568_v52 = vadd.f32 %v565_v50, %v421_v43 }
 0x1f1   : > { %v892_v53 = vmul.f32 -1.442695, %v446_v51  ;;  %v897_v55 = vmul.f32 -1.442695, %v568_v52  ;;  %v1026_v56 = vpop.eup %1025 }
 0x1f2   : > { %v453_v60 = vadd.f32 1.0, %v1026_v56 }
 0x1f3   : > { %1027 = vpow2.f32 %v892_v53 }
 0x1f4   : > { %1029 = vpow2.f32 %v897_v55  ;;  %v466_v37 = vand.u32 2147483648, %v453_v60  ;;  %vm460_vm4 = vweird.f32 %v453_v60  ;;  %v464_v38 = vand.u32 2147483647, %v453_v60 }
 0x1f5   : > { %1031 = vrcp.f32 %v453_v60 }
 0x1f6   : > { %1033 = vpow2.f32 %v896_v61  ;;  %v467_v43 = vor.u32 1.1754944e-38, %v466_v37  ;;  %vm465_vm6 = vcmp.eq.f32.partialorder %v464_v38, 8.507059e+37  ;;  %v1275_v38 = vmov 0  }
 0x1f7   : > { %649 = vrot.lane.b32.xlu1 %v1551_v45, %s1274_s27  ;;  %1022 = vset.pattern.permute.xlu0 %v1275_v38 }
 0x1f8   : > { %1023 = vset.pattern.permute.xlu1 %v1275_v38  ;;  %1024 = vset.pattern.permute.xlu2 %v1275_v38 }
 0x1f9   : > { %v1028_v62 = vpop.eup %1027 }
 0x1fa   : > { %v1030_v63 = vpop.eup %1029  ;;  %v454_v19 = vadd.f32 1.0, %v1028_v62 }
 0x1fb   : > { %v576_v20 = vadd.f32 1.0, %v1030_v63  ;;  %v1032_v21 = vpop.eup %1031 }
 0x1fc   : > { %1035 = vrcp.f32 %v454_v19  ;;  %v1034_v22 = vpop.eup %1033  ;;  %v456_v23 = vmul.f32 %v1032_v21, %v453_v60  ;;  %vm461_vm3 = vweird.f32 %v1032_v21  ;;  %vm475_vm9 = vweird.f32 %v454_v19 }
 0x1fd   : > { %1037 = vrcp.f32 %v576_v20  ;;  %v1573_v24 = vadd.f32 1.0, %v1034_v22  ;;  %vm462_vm5 = vmor %vm460_vm4, %vm461_vm3  ;;  %v603_v54 = vand.u32 2147483648, %v576_v20  ;;  %v481_v55 = vand.u32 2147483648, %v454_v19 }
 0x1fe   : > { %v457_v26 = vsub.f32 1.0, %v456_v23  ;;  %vm597_vm10 = vweird.f32 %v576_v20  ;;  %v601_v56 = vand.u32 2147483647, %v576_v20  ;;  %v479_v34 = vand.u32 2147483647, %v454_v19 }
 0x1ff   : > { %1039 = vrcp.f32 %v1573_v24  ;;  %v482_v22 = vor.u32 1.1754944e-38, %v481_v55  ;;  %vm582_vm0 = vweird.f32 %v1573_v24 }
 0x200   : > { %v458_v29 = vmul.f32 %v1032_v21, %v457_v26  ;;  %vm602_vm13 = vcmp.eq.f32.partialorder %v601_v56, 8.507059e+37  ;;  %vm480_vm14 = vcmp.eq.f32.partialorder %v479_v34, 8.507059e+37 }
 0x202   : > { %v1036_v25 = vpop.eup %1035  ;;  %v459_v33 = vadd.f32 %v1032_v21, %v458_v29 }
 0x203   : > { %v1038_v27 = vpop.eup %1037  ;;  %v471_v30 = vmul.f32 %v1036_v25, %v454_v19  ;;  %vm476_vm7 = vweird.f32 %v1036_v25  ;;  %v588_v19 = vand.u32 2147483648, %v1573_v24 }
 0x204   : > { %v593_v28 = vmul.f32 %v1038_v27, %v576_v20  ;;  %v463_v41 = vsel %vm462_vm5, %v1032_v21, %v459_v33  ;;  %vm598_vm8 = vweird.f32 %v1038_v27  ;;  %vm477_vm11 = vmor %vm475_vm9, %vm476_vm7  ;;  %v604_v21 = vor.u32 1.1754944e-38, %v603_v54 }
 0x205   : > { %v1040_v31 = vpop.eup %1039  ;;  %v472_v36 = vsub.f32 1.0, %v471_v30  ;;  %v1577_v48 = vsel %vm465_vm6, %v467_v43, %v463_v41  ;;  %vm599_vm12 = vmor %vm597_vm10, %vm598_vm8  ;;  %v437_v43 = vstv %s1247_s1  ;;  %s340_s1 = sadd.s32 1, %s1247_s1  }
 0x206   : > { %v594_v32 = vsub.f32 1.0, %v593_v28  ;;  %v578_v39 = vmul.f32 %v1040_v31, %v1573_v24  ;;  %vm583_vm15 = vweird.f32 %v1040_v31  ;;  %vm439_vm5 = vcmp.gt.s32.totalorder %v1352_v1, %v437_v43  ;;  %p339_p3 = scmp.ge.s32.totalorder %s340_s1, %s1685_s0 }
 0x207   : > { %v473_v42 = vmul.f32 %v1036_v25, %v472_v36  ;;  %vm584_vm3 = vmor %vm582_vm0, %vm583_vm15  ;;  %vm438_vm6 = vcmp.gt.s32.totalorder %v1347_v0, %v437_v43 }
 0x208   : > { %v595_v40 = vmul.f32 %v1038_v27, %v594_v32  ;;  %v579_v50 = vsub.f32 1.0, %v578_v39  ;;  %v589_v32 = vor.u32 1.1754944e-38, %v588_v19  ;;  %v566_v39 = vld [vmem:[%s1568_s12 + $0x18] sm:$0xff] }
 0x209   : > { %v474_v53 = vadd.f32 %v1036_v25, %v473_v42 }
 0x20a   : > { %v596_v51 = vadd.f32 %v1038_v27, %v595_v40  ;;  %v580_v62 = vmul.f32 %v1040_v31, %v579_v50 }
 0x20b   : > { %v478_v61 = vsel %vm477_vm11, %v1036_v25, %v474_v53  ;;  %v586_v25 = vand.u32 2147483647, %v1573_v24 }
 0x20c   : > { %v600_v60 = vsel %vm599_vm12, %v1038_v27, %v596_v51  ;;  %v1581_v28 = vsel %vm480_vm14, %v482_v22, %v478_v61  ;;  %v581_v30 = vadd.f32 %v1040_v31, %v580_v62  ;;  %v564_v51 = vld [vmem:[%s1568_s12 + $0x8] sm:$0xff] }
 0x20d   : > { %v605_v23 = vsel %vm602_vm13, %v604_v21, %v600_v60  ;;  %vm587_vm4 = vcmp.eq.f32.partialorder %v586_v25, 8.507059e+37  ;;  %v607_v61 = vadd.f32 %v564_v51, %v1551_v45  ;;  %v608_v21 = vadd.f32 %v566_v39, %v1546_v44 }
 0x20e   : > { %v585_v27 = vsel %vm584_vm3, %v1040_v31, %v581_v30 }
 0x20f   : > { %v590_v36 = vsel %vm587_vm4, %v589_v32, %v585_v27  ;;  %v898_v62 = vmul.f32 -1.442695, %v607_v61 }
 0x249   : > { %v652_v63 = vpop.permute.xlu2 %651 }
 0x24a   : > { %v656_v29 = vmul.f32 %v652_v63, %v605_v23  ;;  %v899_v23 = vmul.f32 -1.442695, %v608_v21 }
 0x259   : > { %v488_v47 = vpop.permute.xlu0 %487 }
 0x25a   : > { %v493_v52 = vmul.f32 %v488_v47, %v1577_v48  ;;  %v557_v47 = vstv %s1562_s10 }
 0x25b   : > { %vm558_vm7 = vcmp.gt.s32.totalorder %v1347_v0, %v557_v47  ;;  %vm559_vm8 = vcmp.gt.s32.totalorder %v1352_v1, %v557_v47 }
 0x25c   : > { %497 = vrot.lane.b32.xlu2 %v493_v52, %s1274_s27  ;;  %v685_v50 = vsel %vm558_vm7, 1, %v1275_v38  ;;  %v686_v60 = vsel %vm559_vm8, 1, %v1275_v38  ;;  %vm709_vm7 = vcmask 523520  }
 0x261   : > { %v490_v26 = vpop.permute.xlu1 %489 }
 0x262   : > { %v494_v20 = vmul.f32 %v490_v26, %v1581_v28  ;;  %v507_v26 = vsub.f32 1.0, %v1577_v48 }
 0x264   : > { %499 = vrot.lane.b32.xlu0 %v494_v20, %s1274_s27  ;;  %661 = vrot.lane.b32.xlu2 %v656_v29, %s1274_s27 }
 0x269   : > { %v650_v33 = vpop.permute.xlu1 %649 }
 0x26a   : > { %v655_v37 = vmul.f32 %v650_v33, %v590_v36 }
 0x26c   : > { %523 = vrot.lane.b32.xlu0 %v1239_v57, %s1273_s26  ;;  %659 = vrot.lane.b32.xlu1 %v655_v37, %s1274_s27  ;;  %v531_v57 = vsel %vm438_vm6, 1, %v1275_v38 }
 0x26d   : > { %521 = vrot.lane.b32.xlu2 %v1243_v35, %s1273_s26  ;;  %v532_v35 = vsel %vm439_vm5, 1, %v1275_v38 }
 0x274   : > { %537 = vperm.xlu1 %1023, %v532_v35  }
 0x2b6   : > { %v498_v24 = vpop.permute.xlu2 %497 }
 0x2b7   : > { %v503_v31 = vadd.f32 %v498_v24, %v1559_v46 }
 0x2b9   : > { %1041 = vtanh.f32 %v503_v31 }
 0x2be   : > { %v662_v40 = vpop.permute.xlu2 %661 }
 0x2bf   : > { %v1042_v41 = vpop.eup %1041  ;;  %v666_v42 = vadd.f32 %v662_v40, %v566_v39 }
 0x2c0   : > { %511 = vrot.lane.b32.xlu0 %v1042_v41, %s1276_s13 }
 0x2c1   : > { %1043 = vtanh.f32 %v666_v42 }
 0x2c7   : > { %v1044_v46 = vpop.eup %1043  ;;  %v1613_v29 = vpop.permute.xlu2 %521 }
 0x2c8   : > { %534 = vperm.xlu0 %1022, %v531_v57   ;;  %675 = vrot.lane.b32.xlu2 %v1044_v46, %s1276_s13  ;;  %v527_v19 = vmul.f32 %v1613_v29, %v1577_v48 }
 0x2d0   : > { %688 = vperm.xlu2 %1024, %v685_v50  }
 0x2d6   : > { %v500_v54 = vpop.permute.xlu0 %499 }
 0x2d7   : > { %v504_v55 = vadd.f32 %v500_v54, %v1566_v49 }
 0x2de   : > { %v660_v52 = vpop.permute.xlu1 %659  ;;  %v1609_v63 = vpop.permute.xlu0 %523 }
 0x2df   : > { %v665_v53 = vadd.f32 %v660_v52, %v564_v51 }
 0x2e1   : > { %1045 = vtanh.f32 %v665_v53 }
 0x2e2   : > { %1047 = vtanh.f32 %v504_v55 }
 0x2e3   : > { %1049 = vpow2.f32 %v898_v62 }
 0x2e4   : > { %1051 = vpow2.f32 %v899_v23  ;;  %v508_v23 = vsub.f32 1.0, %v1581_v28 }
 0x2e6   : > { %v538_v39 = vpop.permute.xlu1 %537 }
 0x2e7   : > { %v1046_v56 = vpop.eup %1045  ;;  %vm540_vm5 = vcmp.eq.s32.totalorder %v538_v39, 1 }
 0x2e8   : > { %673 = vrot.lane.b32.xlu1 %v1046_v56, %s1276_s13  ;;  %v1048_v34 = vpop.eup %1047 }
 0x2e9   : > { %v1050_v22 = vpop.eup %1049 }
 0x2ea   : > { %v615_v20 = vadd.f32 1.0, %v1050_v22  ;;  %v1052_v27 = vpop.eup %1051 }
 0x2eb   : > { %v616_v33 = vadd.f32 1.0, %v1052_v27 }
 0x2ec   : > { %1053 = vrcp.f32 %v615_v20  ;;  %v628_v40 = vand.u32 2147483648, %v615_v20  ;;  %vm622_vm11 = vweird.f32 %v615_v20  ;;  %v626_v42 = vand.u32 2147483647, %v615_v20 }
 0x2ed   : > { %1055 = vrcp.f32 %v616_v33  ;;  %v643_v54 = vand.u32 2147483648, %v616_v33  ;;  %vm637_vm15 = vweird.f32 %v616_v33 }
 0x2ee   : > { %v629_v57 = vor.u32 1.1754944e-38, %v628_v40  ;;  %vm627_vm13 = vcmp.eq.f32.partialorder %v626_v42, 8.507059e+37 }
 0x2ef   : > { %v644_v62 = vor.u32 1.1754944e-38, %v643_v54 }
 0x2f0   : > { %513 = vrot.lane.b32.xlu1 %v1048_v34, %s1276_s13  ;;  %v641_v34 = vand.u32 2147483647, %v616_v33 }
 0x2f2   : > { %v1054_v32 = vpop.eup %1053  ;;  %vm642_vm4 = vcmp.eq.f32.partialorder %v641_v34, 8.507059e+37 }
 0x2f3   : > { %v618_v36 = vmul.f32 %v1054_v32, %v615_v20  ;;  %v1056_v48 = vpop.eup %1055  ;;  %vm623_vm10 = vweird.f32 %v1054_v32  ;;  %v528_v20 = vmul.f32 %v1609_v63, %v1581_v28 }
 0x2f4   : > { %v633_v24 = vmul.f32 %v1056_v48, %v616_v33  ;;  %vm624_vm12 = vmor %vm622_vm11, %vm623_vm10  ;;  %vm638_vm14 = vweird.f32 %v1056_v48 }
 0x2f5   : > { %v619_v37 = vsub.f32 1.0, %v618_v36  ;;  %vm639_vm3 = vmor %vm637_vm15, %vm638_vm14 }
 0x2f6   : > { %v634_v43 = vsub.f32 1.0, %v633_v24 }
 0x2f7   : > { %v620_v38 = vmul.f32 %v1054_v32, %v619_v37 }
 0x2f8   : > { %691 = vperm.xlu1 %1023, %v686_v60   ;;  %v635_v46 = vmul.f32 %v1056_v48, %v634_v43 }
 0x2f9   : > { %v621_v31 = vadd.f32 %v1054_v32, %v620_v38 }
 0x2fa   : > { %v636_v52 = vadd.f32 %v1056_v48, %v635_v46 }
 0x2fb   : > { %v625_v35 = vsel %vm624_vm12, %v1054_v32, %v621_v31 }
 0x2fc   : > { %v630_v47 = vsel %vm627_vm13, %v629_v57, %v625_v35  ;;  %v640_v61 = vsel %vm639_vm3, %v1056_v48, %v636_v52 }
 0x2fd   : > { %v669_v50 = vsub.f32 1.0, %v630_v47  ;;  %v681_v55 = vmul.f32 %v1235_v58, %v630_v47  ;;  %v645_v22 = vsel %vm642_vm4, %v644_v62, %v640_v61 }
 0x2fe   : > { %v682_v33 = vmul.f32 %v1231_v59, %v645_v22 }
 0x322   : > { %v676_v41 = vpop.permute.xlu2 %675 }
 0x32a   : > { %v689_v51 = vpop.permute.xlu2 %688 }
 0x32b   : > { %vm693_vm0 = vcmp.eq.s32.totalorder %v689_v51, 1 }
 0x332   : > { %v512_v49 = vpop.permute.xlu0 %511 }
 0x333   : > { %v517_v30 = vmul.f32 %v512_v49, %v507_v26 }
 0x335   : > { %v1617_v45 = vadd.f32 %v527_v19, %v517_v30  ;;  %v670_v19 = vsub.f32 1.0, %v645_v22 }
 0x337   : > { %v680_v27 = vmul.f32 %v676_v41, %v670_v19 }
 0x339   : > { %v684_v36 = vadd.f32 %v682_v33, %v680_v27 }
 0x33a   : > { %v1619_v25 = vpop.permute.xlu0 %534 }
 0x33b   : > { %vm539_vm9 = vcmp.eq.s32.totalorder %v1619_v25, 1 }
 0x33c   : > { %v543_v44 = vsel %vm539_vm9, %v1617_v45, 0.0 }
 0x33d   : > { %547 = vrot.lane.b32.xlu2 %v543_v44, %s1276_s13 }
 0x35a   : > { %v674_v53 = vpop.permute.xlu1 %673 }
 0x35b   : > { %v679_v56 = vmul.f32 %v674_v53, %v669_v50 }
 0x35d   : > { %v683_v60 = vadd.f32 %v681_v55, %v679_v56 }
 0x35f   : > { %v695_v21 = vsel %vm693_vm0, %v683_v60, %v1235_v58   ;;  %v697_v49 = vsel %vm693_vm0, %v683_v60, 0.0 }
 0x360   : > { %701 = vrot.lane.b32.xlu1 %v697_v49, %s1273_s26  ;;  %v1704_v61 = vmov (%p339_p3), %v695_v21 }
 0x362   : > { %v514_v26 = vpop.permute.xlu1 %513 }
 0x363   : > { %v518_v30 = vmul.f32 %v514_v26, %v508_v23 }
 0x365   : > { %v530_v44 = vadd.f32 %v528_v20, %v518_v30 }
 0x367   : > { %v544_v32 = vsel %vm540_vm5, %v530_v44, 0.0  ;;  %v542_v58 = vsel %vm540_vm5, %v530_v44, %v1609_v63  ;;  %v541_v63 = vsel %vm539_vm9, %v1617_v45, %v1613_v29 }
 0x368   : > { %549 = vrot.lane.b32.xlu0 %v544_v32, %s1276_s13  ;;  %716 = vrot.lane.b32.xlu1 %v542_v58, %s1276_s13  ;;  %v1700_v58 = vmov %v695_v21 }
 0x36a   : > { %v692_v37 = vpop.permute.xlu1 %691 }
 0x36b   : > { %vm694_vm6 = vcmp.eq.s32.totalorder %v692_v37, 1 }
 0x36c   : > { %v696_v28 = vsel %vm694_vm6, %v684_v36, %v1231_v59   ;;  %v698_v48 = vsel %vm694_vm6, %v684_v36, 0.0 }
 0x36d   : > { %703 = vrot.lane.b32.xlu2 %v698_v48, %s1273_s26  ;;  %v1703_v60 = vmov (%p339_p3), %v696_v28 }
 0x370   : > { %714 = vrot.lane.b32.xlu0 %v541_v63, %s1276_s13 }
 0x397   : > { %v548_v38 = vpop.permute.xlu2 %547 }
 0x398   : > { %555 = vst.msk [vmem:[%s554_s15] sm:$0xff] %vm357_vm2, %v548_v38 }
 0x3c7   : > { %v704_v59 = vpop.permute.xlu2 %703 }
 0x3d2   : > { %v702_v24 = vpop.permute.xlu1 %701 }
 0x3da   : > { %v550_v31 = vpop.permute.xlu0 %549  ;;  %v717_v39 = vpop.permute.xlu1 %716  }
 0x3db   : > { %556 = vst.msk [vmem:[%s554_s15 + $0x8] sm:$0xff] %vm357_vm2, %v550_v31  ;;  %v1701_v57 = vmov %v717_v39  ;;  %v1705_v62 = vmov (%p339_p3), %v717_v39 }
 0x3dc   : > { %710 = vst.msk [vmem:[%s708_s4] sm:$0xff] %vm709_vm7, %v702_v24 }
 0x3dd   : > { %711 = vst.msk [vmem:[%s708_s4 + $0x8] sm:$0xff] %vm709_vm7, %v704_v59  ;;  %v1699_v59 = vmov %v696_v28 }
 0x3df   :  { %342 = sbr.rel (!%p339_p3) target bundleno = 236 (0xec), region = 100 }
 0x3e2   : > { %v715_v25 = vpop.permute.xlu0 %714  }
 0x3e3   : > { %v1702_v35 = vmov %v715_v25  ;;  %v1706_v63 = vmov (%p339_p3), %v715_v25 }
 0x3e4 PF:  { %vm720_vm2 = vcmask 261120   ;;  %s732_s20 = sshll.u32 %s1693_s8, 4  ;;  %s1277_s3 = smov [#allocation11]   ;;  %v1263_v63 = vphi %v1698_v63, %v1706_v63   ;;  %v1259_v62 = vphi %v1697_v62, %v1705_v62   ;;  %v1255_v61 = vphi %v1696_v61, %v1704_v61   ;;  %v1251_v60 = vphi %v1695_v60, %v1703_v60   ;;  %s733_s20 = int_to_ptr.hbm [resolvable:$true] %s732_s20 }
 0x3e5   :  { %721 = vst.msk [vmem:[#allocation12] sm:$0xff] %vm720_vm2, %v1263_v63  ;;  %s730_s21 = sshll.u32 %s1277_s3, 4  ;;  %s1278_s22 = smov [#allocation12]   ;;  %s731_s21 = int_to_ptr.vmem [resolvable:$true] %s730_s21 }
 0x3e6   :  { %722 = vst.msk [vmem:[#allocation12 + $0x8] sm:$0xff] %vm720_vm2, %v1259_v62  ;;  %738 = dma.vmem_to_hbm [thread:$0]  %s731_s21, 2048, %s733_s20, [#allocation7], %s1266_s17, %s1266_s17, %s1267_s18  }
 0x3e7   :  { %724 = vst.msk [vmem:[#allocation12 + $0x10] sm:$0xff] %vm720_vm2, %v1255_v61  ;;  %s743_s23 = sshll.u32 %s1278_s22, 4  ;;  %s745_s1 = sshll.u32 %s1694_s9, 4  ;;  %s744_s23 = int_to_ptr.vmem [resolvable:$true] %s743_s23  ;;  %s746_s1 = int_to_ptr.hbm [resolvable:$true] %s745_s1 }
 0x3e8   :  { %725 = vst.msk [vmem:[#allocation12 + $0x18] sm:$0xff] %vm720_vm2, %v1251_v60 }
 0x3e9   :  { %751 = dma.vmem_to_hbm [thread:$0]  %s744_s23, 512, %s746_s1, [#allocation13], %s1266_s17, %s1266_s17, %s1267_s18  }
 0x3ea   :  { %1221 = dma.done.wait [#allocation7], 2048  }
 0x3eb   :  { %1222 = vsyncadd [#allocation7], 4294965248 }
 0x3ec   :  { %1223 = dma.done.wait [#allocation13], 512  }
 0x3ed   :  { %1224 = vsyncadd [#allocation13], 4294966784 }
 0x3ee   :  { %760 = vsyncpa [#allocation6], 1 }
 0x3ef   :  { %761 = vsyncpa [#allocation9], 1 }
 0x3f0   :  { %762 = vsyncpa [#allocation7], 1 }
 0x3f1   :  { %763 = vsyncpa [#allocation13], 1 }

</bundles_post_ra>
